<compile_context>
chip_gen: v5e
topology: v5e:2x2
jax: 0.10.0
libtpu: 0.0.40
codegen_flags: <defaults>
</compile_context>

<pallas_src>
import functools

import jax
import jax.numpy as jnp
from jax.experimental import pallas as pl
from jax.experimental.pallas import tpu as pltpu

NEG_SLOPE = 0.01                 # F.leaky_relu default negative_slope
TB_MAX = 1024                    # batch-tile rows; ~39 MiB peak VMEM @ TB=1024
VMEM_LIMIT = 48 * 1024 * 1024    # safe on v5e/v6e (128 MiB) and v7x (64 MiB phys);
                                 # on v5e/v6e TB_MAX/VMEM_LIMIT could be raised further.


def _leaky_relu(x):
    return jnp.where(x >= 0, x, NEG_SLOPE * x)


def _round_up(n, m):
    return ((n + m - 1) // m) * m


def _mm(a, w_ref):
    """MXU matmul with f32 accumulation; activation is cast to the weight dtype
    (bf16 weights -> bf16 x bf16 MXU matmul, ~3x throughput vs f32 emulation)."""
    w = w_ref[...]
    return jnp.dot(a.astype(w.dtype), w, preferred_element_type=jnp.float32)


def _koopman_kernel(n_out, hidden,
                    x_ref,
                    ew1, eb1, ew2, eb2, ew3, eb3,     # encoder
                    w1cat, b1cat,                     # decoder fc1 with K^s folded in
                    dw2, db2, dw3, db3,               # decoder fc2 / fc3
                    o_ref):                           # (n_out, TB, input_size)
    TB = x_ref.shape[0]

    # ---- encoder: x -> z ---------------------------------------------------
    x = x_ref[...]                                               # (TB, 400)
    h = _leaky_relu(_mm(x, ew1) + eb1[...])                      # (TB, H)
    h = _leaky_relu(_mm(h, ew2) + eb2[...])                      # (TB, H)
    z = _mm(h, ew3) + eb3[...]                                   # (TB, b)

    # ---- decoder fc1 for ALL steps in one matmul (Koopman powers folded) ----
    # w1cat = [K^1@W1 | K^2@W1 | ... | K^steps@W1 | W1]   (b, n_out*H)
    h1 = _leaky_relu(_mm(z, w1cat) + b1cat[...])                 # (TB, n_out*H)

    # Restack the per-step lane blocks along the row axis so the dominant
    # fc2/fc3 matmuls run once with M = n_out*TB.
    h1s = jnp.concatenate(
        [h1[:, s * hidden:(s + 1) * hidden] for s in range(n_out)], axis=0)

    # ---- decoder fc2 / fc3, batched over all steps ---------------------------
    h2 = _leaky_relu(_mm(h1s, dw2) + db2[...])                   # (n_out*TB, H)
    y = _mm(h2, dw3) + db3[...]                                  # (n_out*TB, 400)

    for s in range(n_out):                                       # static row slices
        o_ref[s] = y[s * TB:(s + 1) * TB, :].astype(o_ref.dtype)


def koopman_ae_forward(x, params, *, steps=4, mode="forward", input_size=400,
                       use_bf16=False):
    """Returns (out, out_back) lists, matching koopmanAE.forward semantics."""
    if mode not in ("forward", "backward"):
        # TODO(synk): 'forward-approx'/'backward-approx' not implemented.
        raise NotImplementedError(mode)

    enc, dyn_k, dyn_kb, dec = params
    ew1, eb1, ew2, eb2, ew3, eb3 = enc
    dw1, db1, dw2, db2, dw3, db3 = dec
    b = dyn_k.shape[0]
    hidden = dw2.shape[0]
    n_out = steps + 1

    x2d = x.reshape(-1, input_size).astype(jnp.float32)
    B = x2d.shape[0]

    # ---- batch tiling: even 8-aligned split; >=2 tiles when possible so the
    # "parallel" grid axis can use both TensorCores on v7x --------------------
    n_tiles = max(1, -(-B // TB_MAX))
    if B >= 16:
        n_tiles = max(n_tiles, 2)
    TB = _round_up(-(-B // n_tiles), 8)
    B_pad = TB * n_tiles
    if B_pad != B:
        x2d = jnp.pad(x2d, ((0, B_pad - B), (0, 0)))
    grid = (n_tiles,)

    # ---- fold Koopman powers into the decoder's first layer -----------------
    K = (dyn_k if mode == "forward" else dyn_kb).astype(jnp.float32)
    w1_blocks = []
    pw = jnp.eye(b, dtype=jnp.float32)
    for _ in range(steps):
        pw = pw @ K                                  # K^1 .. K^steps
        w1_blocks.append(pw @ dw1)
    w1_blocks.append(dw1)                            # K^0 for the final decode of z
    w1cat = jnp.concatenate(w1_blocks, axis=1)       # (b, n_out*hidden)
    b1cat = jnp.tile(db1, (1, n_out))                # (1, n_out*hidden)

    mats = [ew1, ew2, ew3, w1cat, dw2, dw3]
    if use_bf16:
        mats = [m.astype(jnp.bfloat16) for m in mats]
    ew1m, ew2m, ew3m, w1catm, dw2m, dw3m = mats

    weights = (ew1m, eb1, ew2m, eb2, ew3m, eb3,
               w1catm, b1cat, dw2m, db2, dw3m, db3)

    # Advisory cost hint (decoder fc3 / HBM output writes dominate).
    flops_row = 2 * (input_size * hidden + hidden * hidden + hidden * b       # encoder
                     + b * n_out * hidden                                      # fc1 (folded)
                     + n_out * (hidden * hidden + hidden * input_size))        # fc2 + fc3
    wbytes = sum(int(w.size) * w.dtype.itemsize for w in weights)
    cost = pl.CostEstimate(flops=B_pad * flops_row, transcendentals=0,
                           bytes_accessed=B_pad * input_size * 4 * (1 + n_out) + wbytes)

    x_spec = pl.BlockSpec((TB, input_size), lambda i: (i, 0))
    o_spec = pl.BlockSpec((n_out, TB, input_size), lambda i: (0, i, 0))
    w_spec = lambda a: pl.BlockSpec(a.shape, lambda i: (0, 0))   # VMEM-resident weights

    out = pl.pallas_call(
        functools.partial(_koopman_kernel, n_out, hidden),
        out_shape=jax.ShapeDtypeStruct((n_out, B_pad, input_size), jnp.float32),
        grid=grid,
        in_specs=[x_spec] + [w_spec(w) for w in weights],
        out_specs=o_spec,
        compiler_params=pltpu.CompilerParams(
            dimension_semantics=("parallel",),      # shard batch across TCs on v7x
            vmem_limit_bytes=VMEM_LIMIT),
        cost_estimate=cost,
    )(x2d, *weights)

    def to_view(y):
        y = y[:B]
        if input_size == 400:
            return y.reshape(-1, 1, 20, 20)
        return y.reshape(-1, 1, input_size)

    outs = [to_view(out[s]) for s in range(n_out)]
    if mode == "forward":
        return outs, []
    return [], outs


# ------------------------- params / reference -------------------------

def init_params(key, alpha=4, b=16, input_size=400):
    """Xavier-normal weights, zero biases (matches init_weights); weights stored (in, out)."""
    hidden = 16 * alpha

    def linear(k, fan_in, fan_out):
        std = (2.0 / (fan_in + fan_out)) ** 0.5
        w = std * jax.random.normal(k, (fan_in, fan_out), dtype=jnp.float32)
        bias = jnp.zeros((1, fan_out), dtype=jnp.float32)
        return w, bias

    keys = jax.random.split(key, 8)
    enc = (*linear(keys[0], input_size, hidden),
           *linear(keys[1], hidden, hidden),
           *linear(keys[2], hidden, b))
    dec = (*linear(keys[3], b, hidden),
           *linear(keys[4], hidden, hidden),
           *linear(keys[5], hidden, input_size))
    # dynamics / backdynamics: "init_scheme" (near-identity), no bias.
    dyn_k = (0.99 * jnp.eye(b, dtype=jnp.float32)
             + 0.01 * jax.random.normal(keys[6], (b, b), dtype=jnp.float32))
    dyn_kb = (0.99 * jnp.eye(b, dtype=jnp.float32)
              + 0.01 * jax.random.normal(keys[7], (b, b), dtype=jnp.float32))
    return enc, dyn_k, dyn_kb, dec


def reference_forward(x, params, *, steps=4, mode="forward", input_size=400):
    enc, dyn_k, dyn_kb, dec = params
    ew1, eb1, ew2, eb2, ew3, eb3 = enc
    dw1, db1, dw2, db2, dw3, db3 = dec
    x2d = x.reshape(-1, input_size).astype(jnp.float32)

    def decode(q):
        d = _leaky_relu(q @ dw1 + db1)
        d = _leaky_relu(d @ dw2 + db2)
        d = d @ dw3 + db3
        if input_size == 400:
            return d.reshape(-1, 1, 20, 20)
        return d.reshape(-1, 1, input_size)

    h = _leaky_relu(x2d @ ew1 + eb1)
    h = _leaky_relu(h @ ew2 + eb2)
    z = h @ ew3 + eb3
    K = dyn_k if mode == "forward" else dyn_kb
    outs = []
    q = z
    for _ in range(steps):
        q = q @ K
        outs.append(decode(q))
    outs.append(decode(z))
    if mode == "forward":
        return outs, []
    return [], outs


if __name__ == "__main__":
    alpha, b, input_size, steps = 4, 16, 400, 4
    key = jax.random.PRNGKey(0)
    k_x, k_x2, k_p = jax.random.split(key, 3)
    params = init_params(k_p, alpha=alpha, b=b, input_size=input_size)

    # -- small batch: single-tile grid ----------------------------------------
    x = jax.random.normal(k_x, (2, 1, 20, 20), dtype=jnp.float32)
    out, out_back = koopman_ae_forward(x, params, steps=steps, mode="forward",
                                       input_size=input_size)
    out = [jax.block_until_ready(o) for o in out]
    ref_out, _ = reference_forward(x, params, steps=steps, mode="forward",
                                   input_size=input_size)
    assert len(out) == steps + 1 and out_back == []
    for o, r in zip(out, ref_out):
        assert o.shape == (2, 1, 20, 20), o.shape
        assert jnp.allclose(o, r, atol=1e-4, rtol=1e-4), "forward mismatch vs reference"

    # -- backward mode (same kernel, backdynamics weights) ---------------------
    _, outb = koopman_ae_forward(x, params, steps=steps, mode="backward",
                                 input_size=input_size)
    outb = [jax.block_until_ready(o) for o in outb]
    _, refb = reference_forward(x, params, steps=steps, mode="backward",
                                input_size=input_size)
    for o, r in zip(outb, refb):
        assert jnp.allclose(o, r, atol=1e-4, rtol=1e-4), "backward mismatch vs reference"

    # -- ragged batch exercising the 2-tile / padded-tail path ------------------
    x2 = jax.random.normal(k_x2, (20, 1, 20, 20), dtype=jnp.float32)
    out2, _ = koopman_ae_forward(x2, params, steps=steps, mode="forward",
                                 input_size=input_size)
    out2 = [jax.block_until_ready(o) for o in out2]
    ref2, _ = reference_forward(x2, params, steps=steps, mode="forward",
                                input_size=input_size)
    for o, r in zip(out2, ref2):
        assert o.shape == (20, 1, 20, 20), o.shape
        assert jnp.allclose(o, r, atol=1e-4, rtol=1e-4), "multi-tile mismatch vs reference"

    # -- optional bf16 MXU-operand fast path (loose tolerance by design) --------
    outbf, _ = koopman_ae_forward(x, params, steps=steps, mode="forward",
                                  input_size=input_size, use_bf16=True)
    outbf = [jax.block_until_ready(o) for o in outbf]
    for o, r in zip(outbf, ref_out):
        assert jnp.allclose(o, r, atol=1e-1, rtol=1e-1), "bf16 path mismatch (loose)"

    print("KERNEL_OK")
</pallas_src>

<mosaic_0001>
module attributes {stable_mosaic.version = 11 : i64} {
  func.func @_koopman_kernel(%arg0: i32, %arg1: memref<8x400xf32, #tpu.memory_space<vmem>>, %arg2: memref<400x64xf32, #tpu.memory_space<vmem>>, %arg3: memref<1x64xf32, #tpu.memory_space<vmem>>, %arg4: memref<64x64xf32, #tpu.memory_space<vmem>>, %arg5: memref<1x64xf32, #tpu.memory_space<vmem>>, %arg6: memref<64x16xf32, #tpu.memory_space<vmem>>, %arg7: memref<1x16xf32, #tpu.memory_space<vmem>>, %arg8: memref<16x320xf32, #tpu.memory_space<vmem>>, %arg9: memref<1x320xf32, #tpu.memory_space<vmem>>, %arg10: memref<64x64xf32, #tpu.memory_space<vmem>>, %arg11: memref<1x64xf32, #tpu.memory_space<vmem>>, %arg12: memref<64x400xf32, #tpu.memory_space<vmem>>, %arg13: memref<1x400xf32, #tpu.memory_space<vmem>>, %arg14: memref<5x8x400xf32, #tpu.memory_space<vmem>>) attributes {dimension_semantics = [#tpu.dimension_semantics<parallel>], iteration_bounds = array<i64: 1>, scalar_prefetch = 0 : i64, scratch_operands = 0 : i64, tpu.core_type = #tpu.core_type<tc>, window_params = [{transform_indices = @transform_0, window_bounds = array<i64: 8, 400>}, {pipeline_mode = #tpu.pipeline_mode<synchronous>, transform_indices = @transform_1, window_bounds = array<i64: 400, 64>}, {pipeline_mode = #tpu.pipeline_mode<synchronous>, transform_indices = @transform_2, window_bounds = array<i64: 1, 64>}, {pipeline_mode = #tpu.pipeline_mode<synchronous>, transform_indices = @transform_3, window_bounds = array<i64: 64, 64>}, {pipeline_mode = #tpu.pipeline_mode<synchronous>, transform_indices = @transform_4, window_bounds = array<i64: 1, 64>}, {pipeline_mode = #tpu.pipeline_mode<synchronous>, transform_indices = @transform_5, window_bounds = array<i64: 64, 16>}, {pipeline_mode = #tpu.pipeline_mode<synchronous>, transform_indices = @transform_6, window_bounds = array<i64: 1, 16>}, {pipeline_mode = #tpu.pipeline_mode<synchronous>, transform_indices = @transform_7, window_bounds = array<i64: 16, 320>}, {pipeline_mode = #tpu.pipeline_mode<synchronous>, transform_indices = @transform_8, window_bounds = array<i64: 1, 320>}, {pipeline_mode = #tpu.pipeline_mode<synchronous>, transform_indices = @transform_9, window_bounds = array<i64: 64, 64>}, {pipeline_mode = #tpu.pipeline_mode<synchronous>, transform_indices = @transform_10, window_bounds = array<i64: 1, 64>}, {pipeline_mode = #tpu.pipeline_mode<synchronous>, transform_indices = @transform_11, window_bounds = array<i64: 64, 400>}, {pipeline_mode = #tpu.pipeline_mode<synchronous>, transform_indices = @transform_12, window_bounds = array<i64: 1, 400>}, {transform_indices = @transform_13, window_bounds = array<i64: 5, 8, 400>}]} {
    %c0 = arith.constant 0 : index
    %c0_0 = arith.constant 0 : index
    %0 = vector.load %arg1[%c0, %c0_0] : memref<8x400xf32, #tpu.memory_space<vmem>>, vector<8x400xf32>
    %c0_1 = arith.constant 0 : index
    %c0_2 = arith.constant 0 : index
    %1 = vector.load %arg2[%c0_1, %c0_2] : memref<400x64xf32, #tpu.memory_space<vmem>>, vector<400x64xf32>
    %cst = arith.constant dense<0.000000e+00> : vector<8x64xf32>
    %2 = tpu.matmul %0, %1, %cst {dimension_numbers = #tpu.dot_dimension_numbers<[1], [0], [0], [1], [0, 0, 1, 1], [], []>} : vector<8x400xf32>, vector<400x64xf32>, vector<8x64xf32> -> vector<8x64xf32>
    %c0_3 = arith.constant 0 : index
    %c0_4 = arith.constant 0 : index
    %3 = vector.load %arg3[%c0_3, %c0_4] : memref<1x64xf32, #tpu.memory_space<vmem>>, vector<1x64xf32>
    %4 = vector.broadcast %3 : vector<1x64xf32> to vector<8x64xf32>
    %5 = arith.addf %2, %4 : vector<8x64xf32>
    %cst_5 = arith.constant 0.000000e+00 : f32
    %6 = vector.broadcast %cst_5 : f32 to vector<8x64xf32>
    %7 = arith.cmpf oge, %5, %6 : vector<8x64xf32>
    %cst_6 = arith.constant 0.00999999977 : f32
    %8 = vector.broadcast %cst_6 : f32 to vector<8x64xf32>
    %9 = arith.mulf %8, %5 : vector<8x64xf32>
    %10 = arith.select %7, %5, %9 : vector<8x64xi1>, vector<8x64xf32>
    %c0_7 = arith.constant 0 : index
    %c0_8 = arith.constant 0 : index
    %11 = vector.load %arg4[%c0_7, %c0_8] : memref<64x64xf32, #tpu.memory_space<vmem>>, vector<64x64xf32>
    %cst_9 = arith.constant dense<0.000000e+00> : vector<8x64xf32>
    %12 = tpu.matmul %10, %11, %cst_9 {dimension_numbers = #tpu.dot_dimension_numbers<[1], [0], [0], [1], [0, 0, 1, 1], [], []>} : vector<8x64xf32>, vector<64x64xf32>, vector<8x64xf32> -> vector<8x64xf32>
    %c0_10 = arith.constant 0 : index
    %c0_11 = arith.constant 0 : index
    %13 = vector.load %arg5[%c0_10, %c0_11] : memref<1x64xf32, #tpu.memory_space<vmem>>, vector<1x64xf32>
    %14 = vector.broadcast %13 : vector<1x64xf32> to vector<8x64xf32>
    %15 = arith.addf %12, %14 : vector<8x64xf32>
    %cst_12 = arith.constant 0.000000e+00 : f32
    %16 = vector.broadcast %cst_12 : f32 to vector<8x64xf32>
    %17 = arith.cmpf oge, %15, %16 : vector<8x64xf32>
    %cst_13 = arith.constant 0.00999999977 : f32
    %18 = vector.broadcast %cst_13 : f32 to vector<8x64xf32>
    %19 = arith.mulf %18, %15 : vector<8x64xf32>
    %20 = arith.select %17, %15, %19 : vector<8x64xi1>, vector<8x64xf32>
    %c0_14 = arith.constant 0 : index
    %c0_15 = arith.constant 0 : index
    %21 = vector.load %arg6[%c0_14, %c0_15] : memref<64x16xf32, #tpu.memory_space<vmem>>, vector<64x16xf32>
    %cst_16 = arith.constant dense<0.000000e+00> : vector<8x16xf32>
    %22 = tpu.matmul %20, %21, %cst_16 {dimension_numbers = #tpu.dot_dimension_numbers<[1], [0], [0], [1], [0, 0, 1, 1], [], []>} : vector<8x64xf32>, vector<64x16xf32>, vector<8x16xf32> -> vector<8x16xf32>
    %c0_17 = arith.constant 0 : index
    %c0_18 = arith.constant 0 : index
    %23 = vector.load %arg7[%c0_17, %c0_18] : memref<1x16xf32, #tpu.memory_space<vmem>>, vector<1x16xf32>
    %24 = vector.broadcast %23 : vector<1x16xf32> to vector<8x16xf32>
    %25 = arith.addf %22, %24 : vector<8x16xf32>
    %c0_19 = arith.constant 0 : index
    %c0_20 = arith.constant 0 : index
    %26 = vector.load %arg8[%c0_19, %c0_20] : memref<16x320xf32, #tpu.memory_space<vmem>>, vector<16x320xf32>
    %cst_21 = arith.constant dense<0.000000e+00> : vector<8x320xf32>
    %27 = tpu.matmul %25, %26, %cst_21 {dimension_numbers = #tpu.dot_dimension_numbers<[1], [0], [0], [1], [0, 0, 1, 1], [], []>} : vector<8x16xf32>, vector<16x320xf32>, vector<8x320xf32> -> vector<8x320xf32>
    %c0_22 = arith.constant 0 : index
    %c0_23 = arith.constant 0 : index
    %28 = vector.load %arg9[%c0_22, %c0_23] : memref<1x320xf32, #tpu.memory_space<vmem>>, vector<1x320xf32>
    %29 = vector.broadcast %28 : vector<1x320xf32> to vector<8x320xf32>
    %30 = arith.addf %27, %29 : vector<8x320xf32>
    %cst_24 = arith.constant 0.000000e+00 : f32
    %31 = vector.broadcast %cst_24 : f32 to vector<8x320xf32>
    %32 = arith.cmpf oge, %30, %31 : vector<8x320xf32>
    %cst_25 = arith.constant 0.00999999977 : f32
    %33 = vector.broadcast %cst_25 : f32 to vector<8x320xf32>
    %34 = arith.mulf %33, %30 : vector<8x320xf32>
    %35 = arith.select %32, %30, %34 : vector<8x320xi1>, vector<8x320xf32>
    %36 = vector.extract_strided_slice %35 {offsets = [0, 0], sizes = [8, 64], strides = [1, 1]} : vector<8x320xf32> to vector<8x64xf32>
    %37 = vector.extract_strided_slice %35 {offsets = [0, 64], sizes = [8, 64], strides = [1, 1]} : vector<8x320xf32> to vector<8x64xf32>
    %38 = vector.extract_strided_slice %35 {offsets = [0, 128], sizes = [8, 64], strides = [1, 1]} : vector<8x320xf32> to vector<8x64xf32>
    %39 = vector.extract_strided_slice %35 {offsets = [0, 192], sizes = [8, 64], strides = [1, 1]} : vector<8x320xf32> to vector<8x64xf32>
    %40 = vector.extract_strided_slice %35 {offsets = [0, 256], sizes = [8, 64], strides = [1, 1]} : vector<8x320xf32> to vector<8x64xf32>
    %41 = tpu.concatenate %36, %37, %38, %39, %40 in 0 : vector<8x64xf32>, vector<8x64xf32>, vector<8x64xf32>, vector<8x64xf32>, vector<8x64xf32> -> vector<40x64xf32>
    %c0_26 = arith.constant 0 : index
    %c0_27 = arith.constant 0 : index
    %42 = vector.load %arg10[%c0_26, %c0_27] : memref<64x64xf32, #tpu.memory_space<vmem>>, vector<64x64xf32>
    %cst_28 = arith.constant dense<0.000000e+00> : vector<40x64xf32>
    %43 = tpu.matmul %41, %42, %cst_28 {dimension_numbers = #tpu.dot_dimension_numbers<[1], [0], [0], [1], [0, 0, 1, 1], [], []>} : vector<40x64xf32>, vector<64x64xf32>, vector<40x64xf32> -> vector<40x64xf32>
    %c0_29 = arith.constant 0 : index
    %c0_30 = arith.constant 0 : index
    %44 = vector.load %arg11[%c0_29, %c0_30] : memref<1x64xf32, #tpu.memory_space<vmem>>, vector<1x64xf32>
    %45 = vector.broadcast %44 : vector<1x64xf32> to vector<40x64xf32>
    %46 = arith.addf %43, %45 : vector<40x64xf32>
    %cst_31 = arith.constant 0.000000e+00 : f32
    %47 = vector.broadcast %cst_31 : f32 to vector<40x64xf32>
    %48 = arith.cmpf oge, %46, %47 : vector<40x64xf32>
    %cst_32 = arith.constant 0.00999999977 : f32
    %49 = vector.broadcast %cst_32 : f32 to vector<40x64xf32>
    %50 = arith.mulf %49, %46 : vector<40x64xf32>
    %51 = arith.select %48, %46, %50 : vector<40x64xi1>, vector<40x64xf32>
    %c0_33 = arith.constant 0 : index
    %c0_34 = arith.constant 0 : index
    %52 = vector.load %arg12[%c0_33, %c0_34] : memref<64x400xf32, #tpu.memory_space<vmem>>, vector<64x400xf32>
    %cst_35 = arith.constant dense<0.000000e+00> : vector<40x400xf32>
    %53 = tpu.matmul %51, %52, %cst_35 {dimension_numbers = #tpu.dot_dimension_numbers<[1], [0], [0], [1], [0, 0, 1, 1], [], []>} : vector<40x64xf32>, vector<64x400xf32>, vector<40x400xf32> -> vector<40x400xf32>
    %c0_36 = arith.constant 0 : index
    %c0_37 = arith.constant 0 : index
    %54 = vector.load %arg13[%c0_36, %c0_37] : memref<1x400xf32, #tpu.memory_space<vmem>>, vector<1x400xf32>
    %55 = vector.broadcast %54 : vector<1x400xf32> to vector<40x400xf32>
    %56 = arith.addf %53, %55 : vector<40x400xf32>
    %57 = vector.extract_strided_slice %56 {offsets = [0, 0], sizes = [8, 400], strides = [1, 1]} : vector<40x400xf32> to vector<8x400xf32>
    %c0_38 = arith.constant 0 : index
    %c0_39 = arith.constant 0 : index
    %c0_40 = arith.constant 0 : index
    %58 = vector.load %arg14[%c0_38, %c0_39, %c0_40] : memref<5x8x400xf32, #tpu.memory_space<vmem>>, vector<1x8x400xf32>
    %59 = vector.shape_cast %58 : vector<1x8x400xf32> to vector<8x400xf32>
    %60 = vector.shape_cast %57 : vector<8x400xf32> to vector<1x8x400xf32>
    tpu.vector_store %arg14[%c0_38, %c0_39, %c0_40], %60 {strides = array<i32>} : memref<5x8x400xf32, #tpu.memory_space<vmem>>, vector<1x8x400xf32>,
    %61 = vector.extract_strided_slice %56 {offsets = [8, 0], sizes = [8, 400], strides = [1, 1]} : vector<40x400xf32> to vector<8x400xf32>
    %c1 = arith.constant 1 : index
    %c0_41 = arith.constant 0 : index
    %c0_42 = arith.constant 0 : index
    %62 = vector.load %arg14[%c1, %c0_41, %c0_42] : memref<5x8x400xf32, #tpu.memory_space<vmem>>, vector<1x8x400xf32>
    %63 = vector.shape_cast %62 : vector<1x8x400xf32> to vector<8x400xf32>
    %64 = vector.shape_cast %61 : vector<8x400xf32> to vector<1x8x400xf32>
    tpu.vector_store %arg14[%c1, %c0_41, %c0_42], %64 {strides = array<i32>} : memref<5x8x400xf32, #tpu.memory_space<vmem>>, vector<1x8x400xf32>,
    %65 = vector.extract_strided_slice %56 {offsets = [16, 0], sizes = [8, 400], strides = [1, 1]} : vector<40x400xf32> to vector<8x400xf32>
    %c2 = arith.constant 2 : index
    %c0_43 = arith.constant 0 : index
    %c0_44 = arith.constant 0 : index
    %66 = vector.load %arg14[%c2, %c0_43, %c0_44] : memref<5x8x400xf32, #tpu.memory_space<vmem>>, vector<1x8x400xf32>
    %67 = vector.shape_cast %66 : vector<1x8x400xf32> to vector<8x400xf32>
    %68 = vector.shape_cast %65 : vector<8x400xf32> to vector<1x8x400xf32>
    tpu.vector_store %arg14[%c2, %c0_43, %c0_44], %68 {strides = array<i32>} : memref<5x8x400xf32, #tpu.memory_space<vmem>>, vector<1x8x400xf32>,
    %69 = vector.extract_strided_slice %56 {offsets = [24, 0], sizes = [8, 400], strides = [1, 1]} : vector<40x400xf32> to vector<8x400xf32>
    %c3 = arith.constant 3 : index
    %c0_45 = arith.constant 0 : index
    %c0_46 = arith.constant 0 : index
    %70 = vector.load %arg14[%c3, %c0_45, %c0_46] : memref<5x8x400xf32, #tpu.memory_space<vmem>>, vector<1x8x400xf32>
    %71 = vector.shape_cast %70 : vector<1x8x400xf32> to vector<8x400xf32>
    %72 = vector.shape_cast %69 : vector<8x400xf32> to vector<1x8x400xf32>
    tpu.vector_store %arg14[%c3, %c0_45, %c0_46], %72 {strides = array<i32>} : memref<5x8x400xf32, #tpu.memory_space<vmem>>, vector<1x8x400xf32>,
    %73 = vector.extract_strided_slice %56 {offsets = [32, 0], sizes = [8, 400], strides = [1, 1]} : vector<40x400xf32> to vector<8x400xf32>
    %c4 = arith.constant 4 : index
    %c0_47 = arith.constant 0 : index
    %c0_48 = arith.constant 0 : index
    %74 = vector.load %arg14[%c4, %c0_47, %c0_48] : memref<5x8x400xf32, #tpu.memory_space<vmem>>, vector<1x8x400xf32>
    %75 = vector.shape_cast %74 : vector<1x8x400xf32> to vector<8x400xf32>
    %76 = vector.shape_cast %73 : vector<8x400xf32> to vector<1x8x400xf32>
    tpu.vector_store %arg14[%c4, %c0_47, %c0_48], %76 {strides = array<i32>} : memref<5x8x400xf32, #tpu.memory_space<vmem>>, vector<1x8x400xf32>,
    return
  }
  func.func @transform_0(%arg0: i32) -> (i32, i32) {
    %c0_i32 = arith.constant 0 : i32
    %c0_i32_0 = arith.constant 0 : i32
    return %arg0, %c0_i32 : i32, i32
  }
  func.func @transform_1(%arg0: i32) -> (i32, i32) {
    %c0_i32 = arith.constant 0 : i32
    %c0_i32_0 = arith.constant 0 : i32
    %c0_i32_1 = arith.constant 0 : i32
    return %c0_i32, %c0_i32_0 : i32, i32
  }
  func.func @transform_2(%arg0: i32) -> (i32, i32) {
    %c0_i32 = arith.constant 0 : i32
    %c0_i32_0 = arith.constant 0 : i32
    %c0_i32_1 = arith.constant 0 : i32
    return %c0_i32, %c0_i32_0 : i32, i32
  }
  func.func @transform_3(%arg0: i32) -> (i32, i32) {
    %c0_i32 = arith.constant 0 : i32
    %c0_i32_0 = arith.constant 0 : i32
    %c0_i32_1 = arith.constant 0 : i32
    return %c0_i32, %c0_i32_0 : i32, i32
  }
  func.func @transform_4(%arg0: i32) -> (i32, i32) {
    %c0_i32 = arith.constant 0 : i32
    %c0_i32_0 = arith.constant 0 : i32
    %c0_i32_1 = arith.constant 0 : i32
    return %c0_i32, %c0_i32_0 : i32, i32
  }
  func.func @transform_5(%arg0: i32) -> (i32, i32) {
    %c0_i32 = arith.constant 0 : i32
    %c0_i32_0 = arith.constant 0 : i32
    %c0_i32_1 = arith.constant 0 : i32
    return %c0_i32, %c0_i32_0 : i32, i32
  }
  func.func @transform_6(%arg0: i32) -> (i32, i32) {
    %c0_i32 = arith.constant 0 : i32
    %c0_i32_0 = arith.constant 0 : i32
    %c0_i32_1 = arith.constant 0 : i32
    return %c0_i32, %c0_i32_0 : i32, i32
  }
  func.func @transform_7(%arg0: i32) -> (i32, i32) {
    %c0_i32 = arith.constant 0 : i32
    %c0_i32_0 = arith.constant 0 : i32
    %c0_i32_1 = arith.constant 0 : i32
    return %c0_i32, %c0_i32_0 : i32, i32
  }
  func.func @transform_8(%arg0: i32) -> (i32, i32) {
    %c0_i32 = arith.constant 0 : i32
    %c0_i32_0 = arith.constant 0 : i32
    %c0_i32_1 = arith.constant 0 : i32
    return %c0_i32, %c0_i32_0 : i32, i32
  }
  func.func @transform_9(%arg0: i32) -> (i32, i32) {
    %c0_i32 = arith.constant 0 : i32
    %c0_i32_0 = arith.constant 0 : i32
    %c0_i32_1 = arith.constant 0 : i32
    return %c0_i32, %c0_i32_0 : i32, i32
  }
  func.func @transform_10(%arg0: i32) -> (i32, i32) {
    %c0_i32 = arith.constant 0 : i32
    %c0_i32_0 = arith.constant 0 : i32
    %c0_i32_1 = arith.constant 0 : i32
    return %c0_i32, %c0_i32_0 : i32, i32
  }
  func.func @transform_11(%arg0: i32) -> (i32, i32) {
    %c0_i32 = arith.constant 0 : i32
    %c0_i32_0 = arith.constant 0 : i32
    %c0_i32_1 = arith.constant 0 : i32
    return %c0_i32, %c0_i32_0 : i32, i32
  }
  func.func @transform_12(%arg0: i32) -> (i32, i32) {
    %c0_i32 = arith.constant 0 : i32
    %c0_i32_0 = arith.constant 0 : i32
    %c0_i32_1 = arith.constant 0 : i32
    return %c0_i32, %c0_i32_0 : i32, i32
  }
  func.func @transform_13(%arg0: i32) -> (i32, i32, i32) {
    %c0_i32 = arith.constant 0 : i32
    %c0_i32_0 = arith.constant 0 : i32
    %c0_i32_1 = arith.constant 0 : i32
    return %c0_i32, %arg0, %c0_i32_0 : i32, i32, i32
  }
}

</mosaic_0001>

<bundles_post_ra>
// kernel: tpu_custom_call.1
= control target key start
LH: loop header
LB: loop body
LE: loop exit
PB: predicated region body
PF: predicated region fallthrough
CT: control target
= control target key end

     0   :  { %vm103_vm0 = vcmask 130048   ;;  %s1235_s0 = inlined_call_operand.vmem [shape: f32[8,400], index: 0, kind: input, shape index: {}]   ;;  %s1236_s1 = inlined_call_operand.vmem [shape: f32[400,64], index: 1, kind: input, shape index: {}]   ;;  %s1237_s2 = inlined_call_operand.vmem [shape: f32[1,64], index: 2, kind: input, shape index: {}]   ;;  %s1238_s3 = inlined_call_operand.vmem [shape: f32[64,64], index: 3, kind: input, shape index: {}]   ;;  %s1239_s4 = inlined_call_operand.vmem [shape: f32[1,64], index: 4, kind: input, shape index: {}]   ;;  %s1240_s5 = inlined_call_operand.vmem [shape: f32[64,16], index: 5, kind: input, shape index: {}]   ;;  %s1241_s6 = inlined_call_operand.vmem [shape: f32[1,16], index: 6, kind: input, shape index: {}]   ;;  %s1242_s7 = inlined_call_operand.vmem [shape: f32[16,320], index: 7, kind: input, shape index: {}]   ;;  %s1243_s8 = inlined_call_operand.vmem [shape: f32[1,320], index: 8, kind: input, shape index: {}]   ;;  %s1244_s9 = inlined_call_operand.vmem [shape: f32[64,64], index: 9, kind: input, shape index: {}]   ;;  %s1245_s10 = inlined_call_operand.vmem [shape: f32[1,64], index: 10, kind: input, shape index: {}]   ;;  %s1246_s11 = inlined_call_operand.vmem [shape: f32[64,400], index: 11, kind: input, shape index: {}]   ;;  %s1247_s12 = inlined_call_operand.vmem [shape: f32[1,400], index: 12, kind: input, shape index: {}]   ;;  %s1248_s13 = inlined_call_operand.hbm [shape: f32[5,8,400], index: 13, kind: output, shape index: {}]  }
   0x1   :  { %v96_v0 = vld [vmem:[%s1236_s1 + $0x178] sm:$0xff]  ;;  %v95_v2 = vld [vmem:[%s1236_s1 + $0x170] sm:$0xff]  ;;  %v94_v5 = vld [vmem:[%s1236_s1 + $0x168] sm:$0xff] }
   0x2   :  { %v64_v1 = vld [vmem:[%s1236_s1 + $0x78] sm:$0xff]  ;;  %147 = vmatpush.msra.mxu2 %v96_v0  ;;  %v63_v3 = vld [vmem:[%s1236_s1 + $0x70] sm:$0xff]  ;;  %v62_v6 = vld [vmem:[%s1236_s1 + $0x68] sm:$0xff] }
   0x3   :  { %107 = vmatpush.msra.mxu0 %v64_v1  ;;  %v80_v4 = vld [vmem:[%s1236_s1 + $0xf8] sm:$0xff]  ;;  %v79_v7 = vld [vmem:[%s1236_s1 + $0xf0] sm:$0xff]  ;;  %v78_v8 = vld [vmem:[%s1236_s1 + $0xe8] sm:$0xff] }
   0x4   :  { %127 = vmatpush.msra.mxu1 %v80_v4  ;;  %148 = vmatpush.msra.mxu2 %v95_v2  ;;  %v93_v9 = vld [vmem:[%s1236_s1 + $0x160] sm:$0xff]  ;;  %v92_v12 = vld [vmem:[%s1236_s1 + $0x158] sm:$0xff]  ;;  %v91_v15 = vld [vmem:[%s1236_s1 + $0x150] sm:$0xff] }
   0x5   :  { %108 = vmatpush.msra.mxu0 %v63_v3  ;;  %v61_v10 = vld [vmem:[%s1236_s1 + $0x60] sm:$0xff]  ;;  %v60_v13 = vld [vmem:[%s1236_s1 + $0x58] sm:$0xff]  ;;  %v59_v16 = vld [vmem:[%s1236_s1 + $0x50] sm:$0xff] }
   0x6   :  { %128 = vmatpush.msra.mxu1 %v79_v7  ;;  %149 = vmatpush.msra.mxu2 %v94_v5  ;;  %v77_v11 = vld [vmem:[%s1236_s1 + $0xe0] sm:$0xff]  ;;  %v76_v14 = vld [vmem:[%s1236_s1 + $0xd8] sm:$0xff]  ;;  %v75_v17 = vld [vmem:[%s1236_s1 + $0xd0] sm:$0xff] }
   0x7   :  { %109 = vmatpush.msra.mxu0 %v62_v6  ;;  %v90_v18 = vld [vmem:[%s1236_s1 + $0x148] sm:$0xff]  ;;  %v89_v21 = vld [vmem:[%s1236_s1 + $0x140] sm:$0xff]  ;;  %v88_v24 = vld [vmem:[%s1236_s1 + $0x138] sm:$0xff] }
   0x8   :  { %129 = vmatpush.msra.mxu1 %v78_v8  ;;  %150 = vmatpush.msra.mxu2 %v93_v9  ;;  %v58_v19 = vld [vmem:[%s1236_s1 + $0x48] sm:$0xff]  ;;  %v57_v22 = vld [vmem:[%s1236_s1 + $0x40] sm:$0xff]  ;;  %v56_v25 = vld [vmem:[%s1236_s1 + $0x38] sm:$0xff] }
   0x9   :  { %110 = vmatpush.msra.mxu0 %v61_v10  ;;  %v74_v20 = vld [vmem:[%s1236_s1 + $0xc8] sm:$0xff]  ;;  %v73_v23 = vld [vmem:[%s1236_s1 + $0xc0] sm:$0xff]  ;;  %v72_v26 = vld [vmem:[%s1236_s1 + $0xb8] sm:$0xff] }
   0xa   :  { %130 = vmatpush.msra.mxu1 %v77_v11  ;;  %151 = vmatpush.msra.mxu2 %v92_v12  ;;  %v98_v27 = vld [vmem:[%s1236_s1 + $0x188] sm:$0xff]  ;;  %v87_v28 = vld [vmem:[%s1236_s1 + $0x130] sm:$0xff]  ;;  %v97_v30 = vld [vmem:[%s1236_s1 + $0x180] sm:$0xff] }
   0xb   :  { %111 = vmatpush.msra.mxu0 %v60_v13  ;;  %v55_v29 = vld [vmem:[%s1236_s1 + $0x30] sm:$0xff]  ;;  %181 = vmatpush.msra.mxu3 %v98_v27  ;;  %v86_v31 = vld [vmem:[%s1236_s1 + $0x128] sm:$0xff]  ;;  %v48_v33 = vld [vmem:[%s1235_s0 + $0x18] sm:$0xff] }
   0xc   :  { %131 = vmatpush.msra.mxu1 %v76_v14  ;;  %152 = vmatpush.msra.mxu2 %v91_v15  ;;  %v71_v32 = vld [vmem:[%s1236_s1 + $0xb0] sm:$0xff]  ;;  %v54_v34 = vld [vmem:[%s1236_s1 + $0x28] sm:$0xff]  ;;  %v85_v35 = vld [vmem:[%s1236_s1 + $0x120] sm:$0xff] }
   0xd   :  { %112 = vmatpush.msra.mxu0 %v59_v16  ;;  %182 = vmatpush.msra.mxu3 %v97_v30  ;;  %v70_v36 = vld [vmem:[%s1236_s1 + $0xa8] sm:$0xff]  ;;  %v53_v37 = vld [vmem:[%s1236_s1 + $0x20] sm:$0xff] }
   0xe   :  { %132 = vmatpush.msra.mxu1 %v75_v17  ;;  %153 = vmatpush.msra.mxu2 %v90_v18 }
   0xf   :  { %113 = vmatpush.msra.mxu0 %v58_v19  ;;  %653 = vmatmul.msk.f32.vlgmr.msra.gmra.mxu3 %vm103_vm0, %v48_v33 }
  0x10   :  { %133 = vmatpush.msra.mxu1 %v74_v20  ;;  %154 = vmatpush.msra.mxu2 %v89_v21 }
  0x11   :  { %114 = vmatpush.msra.mxu0 %v57_v22 }
  0x12   :  { %134 = vmatpush.msra.mxu1 %v73_v23  ;;  %155 = vmatpush.msra.mxu2 %v88_v24 }
  0x13   :  { %115 = vmatpush.msra.mxu0 %v56_v25 }
  0x14   :  { %135 = vmatpush.msra.mxu1 %v72_v26  ;;  %156 = vmatpush.msra.mxu2 %v87_v28 }
  0x15   :  { %116 = vmatpush.msra.mxu0 %v55_v29 }
  0x16   :  { %136 = vmatpush.msra.mxu1 %v71_v32 }
  0x17   :  { %18 = vsyncpa [#allocation3], 0  ;;  %157 = vmatpush.msra.mxu2 %v86_v31  ;;  %117 = vmatpush.msra.mxu0 %v54_v34  ;;  %v69_v38 = vld [vmem:[%s1236_s1 + $0xa0] sm:$0xff]  ;;  %v84_v39 = vld [vmem:[%s1236_s1 + $0x118] sm:$0xff]  ;;  %vm202_vm2 = vcmask 523264   ;;  %s726_s16 = smov 64  }
  0x18   :  { %137 = vmatpush.msra.mxu1 %v70_v36  ;;  %v52_v40 = vld [vmem:[%s1236_s1 + $0x18] sm:$0xff]  ;;  %v83_v42 = vld [vmem:[%s1236_s1 + $0x110] sm:$0xff]  ;;  %v82_v45 = vld [vmem:[%s1236_s1 + $0x108] sm:$0xff]  ;;  %s641_s24 = sshll.u32 %s1248_s13, 4  ;;  %s728_s25 = smov 512   ;;  %s642_s24 = int_to_ptr.hbm [resolvable:$true] %s641_s24 }
  0x19   :  { %158 = vmatpush.msra.mxu2 %v85_v35  ;;  %118 = vmatpush.msra.mxu0 %v53_v37  ;;  %v68_v41 = vld [vmem:[%s1236_s1 + $0x98] sm:$0xff]  ;;  %v51_v43 = vld [vmem:[%s1236_s1 + $0x10] sm:$0xff]  ;;  %v50_v46 = vld [vmem:[%s1236_s1 + $0x8] sm:$0xff] }
  0x1a   :  { %138 = vmatpush.msra.mxu1 %v69_v38  ;;  %v67_v44 = vld [vmem:[%s1236_s1 + $0x90] sm:$0xff]  ;;  %v66_v47 = vld [vmem:[%s1236_s1 + $0x88] sm:$0xff]  ;;  %v81_v48 = vld [vmem:[%s1236_s1 + $0x100] sm:$0xff] }
  0x1b   :  { %159 = vmatpush.msra.mxu2 %v84_v39  ;;  %119 = vmatpush.msra.mxu0 %v52_v40  ;;  %v49_v49 = vld [vmem:[%s1236_s1] sm:$0xff]  ;;  %v47_v50 = vld [vmem:[%s1235_s0 + $0x10] sm:$0xff]  ;;  %v197_v53 = vld [vmem:[%s1238_s3 + $0x38] sm:$0xff] }
  0x1c   :  { %139 = vmatpush.msra.mxu1 %v68_v41  ;;  %v45_v51 = vld [vmem:[%s1235_s0] sm:$0xff]  ;;  %v46_v54 = vld [vmem:[%s1235_s0 + $0x8] sm:$0xff]  ;;  %v196_v55 = vld [vmem:[%s1238_s3 + $0x30] sm:$0xff] }
  0x1d   :  { %160 = vmatpush.msra.mxu2 %v83_v42  ;;  %120 = vmatpush.msra.mxu0 %v51_v43  ;;  %v65_v52 = vld [vmem:[%s1236_s1 + $0x80] sm:$0xff]  ;;  %v195_v56 = vld [vmem:[%s1238_s3 + $0x28] sm:$0xff]  ;;  %v193_v58 = vld [vmem:[%s1238_s3 + $0x18] sm:$0xff] }
  0x1e   :  { %140 = vmatpush.msra.mxu1 %v67_v44  ;;  %v194_v57 = vld [vmem:[%s1238_s3 + $0x20] sm:$0xff]  ;;  %v192_v59 = vld [vmem:[%s1238_s3 + $0x10] sm:$0xff]  ;;  %v191_v60 = vld [vmem:[%s1238_s3 + $0x8] sm:$0xff] }
  0x1f   :  { %161 = vmatpush.msra.mxu2 %v82_v45  ;;  %121 = vmatpush.msra.mxu0 %v50_v46  ;;  %v190_v61 = vld [vmem:[%s1238_s3] sm:$0xff]  ;;  %v236_v62 = vld [vmem:[%s1240_s5 + $0x38] sm:$0xff]  ;;  %v235_v63 = vld [vmem:[%s1240_s5 + $0x30] sm:$0xff] }
  0x20   :  { %141 = vmatpush.msra.mxu1 %v66_v47  ;;  %252 = vmatpush.msrb.mxu3 %v236_v62  ;;  %v234_v0 = vld [vmem:[%s1240_s5 + $0x28] sm:$0xff]  ;;  %v233_v1 = vld [vmem:[%s1240_s5 + $0x20] sm:$0xff]  ;;  %v232_v2 = vld [vmem:[%s1240_s5 + $0x18] sm:$0xff] }
  0x21   :  { %162 = vmatpush.msra.mxu2 %v81_v48  ;;  %122 = vmatpush.msra.mxu0 %v49_v49  ;;  %v696_v3 = vld [vmem:[%s1237_s2] ss:$0 sm:$0xff]  ;;  %v231_v14 = vld [vmem:[%s1240_s5 + $0x10] sm:$0xff]  ;;  %v230_v15 = vld [vmem:[%s1240_s5 + $0x8] sm:$0xff] }
  0x22   :  { %163 = vmatmul.f32.vlgmr.msra.gmra.mxu2 %v47_v50  ;;  %123 = vmatmul.f32.vlgmr.msra.gmra.mxu0 %v45_v51  ;;  %v229_v16 = vld [vmem:[%s1240_s5] sm:$0xff]  ;;  %v267_v17 = vld [vmem:[%s1242_s7 + $0x18] sm:$0xff]  ;;  %v265_v25 = vld [vmem:[%s1242_s7 + $0x8] sm:$0xff] }
  0x23   :  { %142 = vmatpush.msra.mxu1 %v65_v52  ;;  %214 = vmatpush.msrb.mxu0 %v197_v53  ;;  %v264_v18 = vld [vmem:[%s1242_s7] sm:$0xff]  ;;  %v269_v26 = vld [vmem:[%s1242_s7 + $0x28] sm:$0xff]  ;;  %v266_v27 = vld [vmem:[%s1242_s7 + $0x10] sm:$0xff] }
  0x24   :  { %143 = vmatmul.f32.vlgmr.msra.gmra.mxu1 %v46_v54  ;;  %253 = vmatpush.msrb.mxu3 %v235_v63  ;;  %v697_v19 = vld [vmem:[%s1239_s4] ss:$0 sm:$0xff]  ;;  %v363_v28 = vld [vmem:[%s1244_s9 + $0x38] sm:$0xff]  ;;  %v362_v29 = vld [vmem:[%s1244_s9 + $0x30] sm:$0xff] }
  0x25   :  { %215 = vmatpush.msrb.mxu0 %v196_v55  ;;  %295 = vmatpush.msrb.mxu2 %v267_v17  ;;  %v268_v24 = vld [vmem:[%s1242_s7 + $0x20] sm:$0xff]  ;;  %v361_v33 = vld [vmem:[%s1244_s9 + $0x28] sm:$0xff]  ;;  %v359_v35 = vld [vmem:[%s1244_s9 + $0x18] sm:$0xff] }
  0x26   :  { %254 = vmatpush.msrb.mxu3 %v234_v0  ;;  %315 = vmatpush.msrb.mxu1 %v268_v24  ;;  %v698_v30 = vld [vmem:[%s1241_s6] ss:$0 sm:$0xff]  ;;  %v358_v36 = vld [vmem:[%s1244_s9 + $0x10] sm:$0xff]  ;;  %v357_v37 = vld [vmem:[%s1244_s9 + $0x8] sm:$0xff]  ;;  %s729_s6 = smov 32  }
  0x27   :  { %216 = vmatpush.msrb.mxu0 %v195_v56  ;;  %296 = vmatpush.msrb.mxu2 %v264_v18  ;;  %v360_v34 = vld [vmem:[%s1244_s9 + $0x20] sm:$0xff]  ;;  %v455_v51 = vld [vmem:[%s1246_s11 + $0xe8] sm:$0xff]  ;;  %v456_v52 = vld [vmem:[%s1246_s11 + $0xf0] sm:$0xff] }
  0x28   :  { %255 = vmatpush.msrb.mxu3 %v233_v1  ;;  %316 = vmatpush.msrb.mxu1 %v265_v25  ;;  %v356_v38 = vld [vmem:[%s1244_s9] sm:$0xff]  ;;  %v451_v54 = vld [vmem:[%s1246_s11 + $0xc8] sm:$0xff]  ;;  %v452_v55 = vld [vmem:[%s1246_s11 + $0xd0] sm:$0xff] }
  0x29   :  { %217 = vmatpush.msrb.mxu0 %v194_v57  ;;  %335 = vmatpush.msra.mxu2 %v269_v26  ;;  %v1070_v39 = vld [vmem:[%s1243_s8] sm:$0x7]  ;;  %v447_v57 = vld [vmem:[%s1246_s11 + $0xa8] sm:$0xff]  ;;  %v440_v0 = vld [vmem:[%s1246_s11 + $0x70] sm:$0xff] }
  0x2a   :  { %256 = vmatpush.msrb.mxu3 %v232_v2  ;;  %v272_v40 = vperm.slane %v1070_v39, 0  ;;  %v273_v42 = vperm.slane %v1070_v39, 1  ;;  %v454_v50 = vld [vmem:[%s1246_s11 + $0xe0] sm:$0xff]  ;;  %523 = vmatpush.msra.mxu1 %v455_v51  ;;  %v439_v63 = vld [vmem:[%s1246_s11 + $0x68] sm:$0xff]  ;;  %v433_v17 = vld [vmem:[%s1246_s11 + $0x38] sm:$0xff]  ;;  %v274_v18 = vperm.slane %v1070_v39, 2 }
  0x2b   :  { %218 = vmatpush.msrb.mxu0 %v193_v58  ;;  %336 = vmatpush.msra.mxu2 %v266_v27  ;;  %v450_v53 = vld [vmem:[%s1246_s11 + $0xc0] sm:$0xff]  ;;  %v448_v58 = vld [vmem:[%s1246_s11 + $0xb0] sm:$0xff]  ;;  %v435_v2 = vld [vmem:[%s1246_s11 + $0x48] sm:$0xff] }
  0x2c   :  { %257 = vmatpush.msrb.mxu3 %v231_v14  ;;  %524 = vmatpush.msra.mxu1 %v451_v54  ;;  %v446_v56 = vld [vmem:[%s1246_s11 + $0xa0] sm:$0xff]  ;;  %v441_v14 = vld [vmem:[%s1246_s11 + $0x78] sm:$0xff] }
  0x2d   :  { %219 = vmatpush.msrb.mxu0 %v192_v59  ;;  %v442_v59 = vld [vmem:[%s1246_s11 + $0x80] sm:$0xff] }
  0x2e   :  { %258 = vmatpush.msrb.mxu3 %v230_v15  ;;  %525 = vmatpush.msra.mxu1 %v447_v57  ;;  %v438_v62 = vld [vmem:[%s1246_s11 + $0x60] sm:$0xff] }
  0x2f   :  { %220 = vmatpush.msrb.mxu0 %v191_v60  ;;  %v443_v60 = vld [vmem:[%s1246_s11 + $0x88] sm:$0xff]  ;;  %v434_v1 = vld [vmem:[%s1246_s11 + $0x40] sm:$0xff] }
  0x30   :  { %259 = vmatpush.msrb.mxu3 %v229_v16  ;;  %526 = vmatpush.msra.mxu1 %v443_v60  ;;  %v437_v16 = vld [vmem:[%s1246_s11 + $0x58] sm:$0xff] }
  0x31   :  { %221 = vmatpush.msrb.mxu0 %v190_v61  ;;  %v444_v61 = vld [vmem:[%s1246_s11 + $0x90] sm:$0xff] }
  0x32   :  { %387 = vmatpush.msra.mxu3 %v363_v28  ;;  %527 = vmatpush.msra.mxu1 %v439_v63 }
  0x33   :  { %491 = vmatpush.msra.mxu0 %v454_v50 }
  0x34   :  { %388 = vmatpush.msra.mxu3 %v362_v29  ;;  %528 = vmatpush.msra.mxu1 %v435_v2  ;;  %v429_v29 = vld [vmem:[%s1246_s11 + $0x18] sm:$0xff] }
  0x35   :  { %492 = vmatpush.msra.mxu0 %v450_v53 }
  0x36   :  { %389 = vmatpush.msra.mxu3 %v361_v33 }
  0x37   :  { %493 = vmatpush.msra.mxu0 %v446_v56 }
  0x38   :  { %390 = vmatpush.msra.mxu3 %v360_v34 }
  0x39   :  { %494 = vmatpush.msra.mxu0 %v442_v59 }
  0x3a   :  { %391 = vmatpush.msra.mxu3 %v359_v35 }
  0x3b   :  { %495 = vmatpush.msra.mxu0 %v438_v62 }
  0x3c   :  { %392 = vmatpush.msra.mxu3 %v358_v36  ;;  %v458_v36 = vld [vmem:[%s1247_s12] sm:$0xf] }
  0x3d   :  { %496 = vmatpush.msra.mxu0 %v434_v1  ;;  %v1193_v39 = vperm.slane %v458_v36, 0  ;;  %v463_v60 = vperm.slane %v458_v36, 3 }
  0x3e   :  { %393 = vmatpush.msra.mxu3 %v357_v37 }
  0x40   :  { %394 = vmatpush.msra.mxu3 %v356_v38 }
  0x92   :  { %v184_v9 = vpop.f32.mrf.mxu3 }
  0x9f   :  { %v124_v4 = vpop.f32.mrf.mxu0 }
  0xa0   :  { %v125_v5 = vadd.f32 %v696_v3, %v124_v4  ;;  %v436_v3 = vld [vmem:[%s1246_s11 + $0x50] sm:$0xff]  ;;  %v430_v4 = vld [vmem:[%s1246_s11 + $0x20] sm:$0xff] }
  0xa1   :  { %v144_v6 = vpop.f32.mrf.mxu1  ;;  %497 = vmatpush.msra.mxu0 %v430_v4 }
  0xa2   :  { %v145_v7 = vadd.f32 %v144_v6, %v125_v5  ;;  %v431_v5 = vld [vmem:[%s1246_s11 + $0x28] sm:$0xff]  ;;  %v432_v6 = vld [vmem:[%s1246_s11 + $0x30] sm:$0xff] }
  0xa3   :  { %529 = vmatpush.msra.mxu1 %v431_v5 }
  0xa5   :  { %v164_v8 = vpop.f32.mrf.mxu2 }
  0xa6   :  { %v165_v10 = vadd.f32 %v164_v8, %v145_v7  ;;  %v426_v7 = vld [vmem:[%s1246_s11] sm:$0xff]  ;;  %v427_v8 = vld [vmem:[%s1246_s11 + $0x8] sm:$0xff] }
  0xa7   :  { %498 = vmatpush.msra.mxu0 %v426_v7  ;;  %530 = vmatpush.msra.mxu1 %v427_v8 }
  0xa8   :  { %v185_v11 = vadd.f32 %v184_v9, %v165_v10  ;;  %v428_v9 = vld [vmem:[%s1246_s11 + $0x10] sm:$0xff]  ;;  %v457_v10 = vld [vmem:[%s1246_s11 + $0xf8] sm:$0xff] }
  0xaa   :  { %vm187_vm1 = vcmp.ge.f32.partialorder %v185_v11, 0.0  ;;  %v188_v12 = vmul.f32 0.01, %v185_v11 }
  0xac   :  { %v189_v13 = vsel %vm187_vm1, %v185_v11, %v188_v12  ;;  %v453_v11 = vld [vmem:[%s1246_s11 + $0xd8] sm:$0xff] }
  0xad   :  { %654 = vmatmul.msk.f32.vlgmr.msrb.gmra.mxu0 %vm202_vm2, %v189_v13  ;;  %v449_v12 = vld [vmem:[%s1246_s11 + $0xb8] sm:$0xff] }
  0xae   :  { %v445_v13 = vld [vmem:[%s1246_s11 + $0x98] sm:$0xff]  ;;  %s727_s11 = smov [#allocation2]  }
  0xaf   :  { %s639_s12 = sshll.u32 %s727_s11, 4  ;;  %s640_s12 = int_to_ptr.vmem [resolvable:$true] %s639_s12 }
 0x12a   :  { %v223_v20 = vpop.f32.mrf.mxu0 }
 0x12b   :  { %v224_v21 = vadd.f32 %v697_v19, %v223_v20  ;;  %v699_v20 = vld [vmem:[%s1245_s10] ss:$0 sm:$0xff] }
 0x12d   :  { %vm226_vm3 = vcmp.ge.f32.partialorder %v224_v21, 0.0  ;;  %v227_v22 = vmul.f32 0.01, %v224_v21 }
 0x12f   :  { %v228_v23 = vsel %vm226_vm3, %v224_v21, %v227_v22 }
 0x130   :  { %655 = vmatmul.msk.f32.vlgmr.msrb.gmra.mxu3 %vm202_vm2, %v228_v23 }
 0x131   :  { %684 = vmatpush.msrb.mxu3 %v457_v10 }
 0x133   :  { %685 = vmatpush.msrb.mxu3 %v453_v11 }
 0x135   :  { %686 = vmatpush.msrb.mxu3 %v449_v12 }
 0x137   :  { %687 = vmatpush.msrb.mxu3 %v445_v13 }
 0x139   :  { %688 = vmatpush.msrb.mxu3 %v441_v14 }
 0x13b   :  { %689 = vmatpush.msrb.mxu3 %v437_v16 }
 0x13d   :  { %690 = vmatpush.msrb.mxu3 %v433_v17 }
 0x13f   :  { %691 = vmatpush.msrb.mxu3 %v429_v29 }
 0x1b3   :  { %v261_v31 = vpop.f32.mrf.mxu3 }
 0x1b4   :  { %v262_v32 = vadd.f32 %v698_v30, %v261_v31 }
 0x1b6   :  { %656 = vmatmul.msk.f32.vlgmr.msrb.gmra.mxu2 %vm103_vm0, %v262_v32  ;;  %657 = vmatmul.msk.f32.vlgmr.msrb.gmra.mxu1 %vm103_vm0, %v262_v32 }
 0x1b7   :  { %555 = vmatpush.msrb.mxu2 %v456_v52  ;;  %587 = vmatpush.msrb.mxu1 %v457_v10 }
 0x1b9   :  { %556 = vmatpush.msrb.mxu2 %v452_v55  ;;  %588 = vmatpush.msrb.mxu1 %v453_v11 }
 0x1bb   :  { %557 = vmatpush.msrb.mxu2 %v448_v58  ;;  %589 = vmatpush.msrb.mxu1 %v449_v12 }
 0x1bd   :  { %558 = vmatpush.msrb.mxu2 %v444_v61  ;;  %590 = vmatpush.msrb.mxu1 %v445_v13 }
 0x1be   :  { %658 = vmatmul.msk.f32.vlgmr.msra.gmra.mxu2 %vm103_vm0, %v262_v32 }
 0x1bf   :  { %559 = vmatpush.msrb.mxu2 %v440_v0  ;;  %591 = vmatpush.msrb.mxu1 %v441_v14 }
 0x1c1   :  { %560 = vmatpush.msrb.mxu2 %v436_v3  ;;  %592 = vmatpush.msrb.mxu1 %v437_v16 }
 0x1c3   :  { %561 = vmatpush.msrb.mxu2 %v432_v6  ;;  %593 = vmatpush.msrb.mxu1 %v433_v17 }
 0x1c5   :  { %562 = vmatpush.msrb.mxu2 %v428_v9  ;;  %594 = vmatpush.msrb.mxu1 %v429_v29 }
 0x233   :  { %v318_v44 = vpop.f32.mrf.mxu1 }
 0x234   :  { %v319_v46 = vadd.f32 %v318_v44, %v273_v42 }
 0x236   :  { %v345_v48 = vmul.f32 0.01, %v319_v46  ;;  %vm342_vm5 = vcmp.ge.f32.partialorder %v319_v46, 0.0 }
 0x238   :  { %v1075_v49 = vsel %vm342_vm5, %v319_v46, %v345_v48  ;;  %v1203_v48 = vperm.slane %v458_v36, 2 }
 0x239   :  { %v298_v41 = vpop.f32.mrf.mxu2 }
 0x23a   :  { %v299_v43 = vadd.f32 %v298_v41, %v272_v40  ;;  %v1197_v40 = vperm.slane %v458_v36, 1 }
 0x23c   :  { %vm341_vm4 = vcmp.ge.f32.partialorder %v299_v43, 0.0  ;;  %v344_v45 = vmul.f32 0.01, %v299_v43 }
 0x23e   :  { %v347_v47 = vsel %vm341_vm4, %v299_v43, %v344_v45 }
 0x23f   :  { %351 = vrot.lane.b32.xlu0 %v347_v47, %s726_s16  ;;  %659 = vmatmul.msk.f32.vlgmr.msra.gmra.mxu3 %vm202_vm2, %v347_v47 }
 0x241   :  { %v338_v19 = vpop.f32.mrf.mxu2 }
 0x242   :  { %v339_v21 = vadd.f32 %v338_v19, %v274_v18 }
 0x244   :  { %v346_v25 = vmul.f32 0.01, %v339_v21  ;;  %vm343_vm7 = vcmp.ge.f32.partialorder %v339_v21, 0.0 }
 0x246   :  { %v349_v28 = vsel %vm343_vm7, %v339_v21, %v346_v25 }
 0x247   :  { %354 = vrot.lane.b32.xlu0 %v1075_v49, %s726_s16 }
 0x2b1   :  { %v352_v15 = vpop.permute.xlu0 %351 }
 0x2b2   :  { %660 = vmatmul.msk.f32.gmra.mxu3 %vm202_vm2, %v352_v15 }
 0x2b9   :  { %v355_v22 = vpop.permute.xlu0 %354 }
 0x2ba   :  { %661 = vmatmul.msk.f32.gmra.mxu3 %vm202_vm2, %v1075_v49 }
 0x2c2   :  { %v396_v23 = vpop.f32.mrf.mxu3  ;;  %662 = vmatmul.msk.f32.gmra.mxu3 %vm202_vm2, %v355_v22 }
 0x2c3   :  { %v397_v24 = vadd.f32 %v699_v20, %v396_v23 }
 0x2c5   :  { %vm411_vm6 = vcmp.ge.f32.partialorder %v397_v24, 0.0  ;;  %v416_v26 = vmul.f32 0.01, %v397_v24 }
 0x2c7   :  { %v421_v27 = vsel %vm411_vm6, %v397_v24, %v416_v26 }
 0x2c8   :  { %664 = vmatmul.msk.f32.vlgmr.msra.gmra.mxu0 %vm202_vm2, %v421_v27  ;;  %669 = vmatmul.msk.f32.vlgmr.msra.gmra.mxu1 %vm202_vm2, %v421_v27 }
 0x2c9   :  { %674 = vmatmul.msk.f32.vlgmr.msrb.gmra.mxu2 %vm202_vm2, %v421_v27 }
 0x2ca   :  { %663 = vmatmul.msk.f32.gmra.mxu3 %vm202_vm2, %v349_v28 }
 0x335   :  { %v399_v30 = vpop.f32.mrf.mxu3 }
 0x336   :  { %v400_v31 = vadd.f32 %v699_v20, %v399_v30 }
 0x338   :  { %vm412_vm8 = vcmp.ge.f32.partialorder %v400_v31, 0.0  ;;  %v417_v32 = vmul.f32 0.01, %v400_v31 }
 0x33a   :  { %v422_v33 = vsel %vm412_vm8, %v400_v31, %v417_v32 }
 0x33b   :  { %665 = vmatmul.msk.f32.gmra.mxu0 %vm202_vm2, %v422_v33  ;;  %670 = vmatmul.msk.f32.gmra.mxu1 %vm202_vm2, %v422_v33 }
 0x33c   :  { %675 = vmatmul.msk.f32.gmra.mxu2 %vm202_vm2, %v422_v33  ;;  %680 = vmatmul.msk.f32.vlgmr.msrb.gmra.mxu3 %vm202_vm2, %v422_v33 }
 0x33d   :  { %v402_v34 = vpop.f32.mrf.mxu3 }
 0x33e   :  { %v403_v35 = vadd.f32 %v699_v20, %v402_v34 }
 0x340   :  { %vm413_vm9 = vcmp.ge.f32.partialorder %v403_v35, 0.0  ;;  %v418_v37 = vmul.f32 0.01, %v403_v35 }
 0x342   :  { %v423_v38 = vsel %vm413_vm9, %v403_v35, %v418_v37 }
 0x343   :  { %666 = vmatmul.msk.f32.gmra.mxu0 %vm202_vm2, %v423_v38  ;;  %671 = vmatmul.msk.f32.gmra.mxu1 %vm202_vm2, %v423_v38 }
 0x344   :  { %676 = vmatmul.msk.f32.gmra.mxu2 %vm202_vm2, %v423_v38  ;;  %681 = vmatmul.msk.f32.gmra.mxu3 %vm202_vm2, %v423_v38 }
 0x345   :  { %v405_v41 = vpop.f32.mrf.mxu3  ;;  %v500_v42 = vpop.f32.mrf.mxu0 }
 0x346   :  { %v406_v43 = vadd.f32 %v699_v20, %v405_v41  ;;  %v501_v44 = vadd.f32 %v500_v42, %v1193_v39  ;;  %v532_v45 = vpop.f32.mrf.mxu1 }
 0x347   :  { %v533_v46 = vadd.f32 %v532_v45, %v1197_v40 }
 0x348   :  { %vm414_vm10 = vcmp.ge.f32.partialorder %v406_v43, 0.0  ;;  %v419_v47 = vmul.f32 0.01, %v406_v43  ;;  %611 = vst [vmem:[#allocation2] sm:$0xff] %v501_v44 }
 0x349   :  { %612 = vst [vmem:[#allocation2 + $0x8] sm:$0xff] %v533_v46 }
 0x34a   :  { %v424_v49 = vsel %vm414_vm10, %v406_v43, %v419_v47 }
 0x34b   :  { %667 = vmatmul.msk.f32.gmra.mxu0 %vm202_vm2, %v424_v49  ;;  %672 = vmatmul.msk.f32.gmra.mxu1 %vm202_vm2, %v424_v49 }
 0x34c   :  { %v564_v50 = vpop.f32.mrf.mxu2  ;;  %677 = vmatmul.msk.f32.gmra.mxu2 %vm202_vm2, %v424_v49  ;;  %682 = vmatmul.msk.f32.gmra.mxu3 %vm202_vm2, %v424_v49 }
 0x34d   :  { %v565_v51 = vadd.f32 %v564_v50, %v1203_v48  ;;  %v408_v52 = vpop.f32.mrf.mxu3 }
 0x34e   :  { %v409_v53 = vadd.f32 %v699_v20, %v408_v52 }
 0x34f   :  { %613 = vst [vmem:[#allocation2 + $0x10] sm:$0xff] %v565_v51 }
 0x350   :  { %vm415_vm11 = vcmp.ge.f32.partialorder %v409_v53, 0.0  ;;  %v420_v54 = vmul.f32 0.01, %v409_v53 }
 0x352   :  { %v425_v55 = vsel %vm415_vm11, %v409_v53, %v420_v54 }
 0x353   :  { %668 = vmatmul.msk.f32.gmra.mxu0 %vm202_vm2, %v425_v55  ;;  %673 = vmatmul.msk.f32.gmra.mxu1 %vm202_vm2, %v425_v55 }
 0x354   :  { %678 = vmatmul.msk.f32.gmra.mxu2 %vm202_vm2, %v425_v55  ;;  %683 = vmatmul.msk.f32.gmra.mxu3 %vm202_vm2, %v425_v55 }
 0x35b   :  { %679 = vmatmul.msk.f32.vlgmr.msrb.gmra.mxu1 %vm202_vm2, %v421_v27 }
 0x3b8   :  { %v503_v56 = vpop.f32.mrf.mxu0  ;;  %v535_v57 = vpop.f32.mrf.mxu1 }
 0x3b9   :  { %v504_v58 = vadd.f32 %v503_v56, %v1193_v39  ;;  %v536_v59 = vadd.f32 %v535_v57, %v1197_v40 }
 0x3bb   :  { %616 = vst [vmem:[#allocation2 + $0x20] sm:$0xff] %v504_v58 }
 0x3bc   :  { %617 = vst [vmem:[#allocation2 + $0x28] sm:$0xff] %v536_v59 }
 0x3bf   :  { %v567_v61 = vpop.f32.mrf.mxu2  ;;  %v599_v62 = vpop.f32.mrf.mxu3 }
 0x3c0   :  { %v568_v63 = vadd.f32 %v567_v61, %v1203_v48  ;;  %v600_v0 = vadd.f32 %v599_v62, %v463_v60  ;;  %v506_v1 = vpop.f32.mrf.mxu0  ;;  %v538_v2 = vpop.f32.mrf.mxu1 }
 0x3c1   :  { %v507_v3 = vadd.f32 %v506_v1, %v1193_v39  ;;  %v539_v4 = vadd.f32 %v538_v2, %v1197_v40 }
 0x3c2   :  { %618 = vst [vmem:[#allocation2 + $0x30] sm:$0xff] %v568_v63 }
 0x3c3   :  { %619 = vst.msk [vmem:[#allocation2 + $0x38] sm:$0xff] %vm103_vm0, %v600_v0 }
 0x3c4   :  { %621 = vst [vmem:[#allocation2 + $0x40] sm:$0xff] %v507_v3 }
 0x3c5   :  { %622 = vst [vmem:[#allocation2 + $0x48] sm:$0xff] %v539_v4 }
 0x3c7   :  { %v570_v5 = vpop.f32.mrf.mxu2  ;;  %v602_v6 = vpop.f32.mrf.mxu3 }
 0x3c8   :  { %v571_v7 = vadd.f32 %v570_v5, %v1203_v48  ;;  %v603_v8 = vadd.f32 %v602_v6, %v463_v60  ;;  %v509_v9 = vpop.f32.mrf.mxu0  ;;  %v541_v10 = vpop.f32.mrf.mxu1 }
 0x3c9   :  { %v510_v11 = vadd.f32 %v509_v9, %v1193_v39  ;;  %v542_v12 = vadd.f32 %v541_v10, %v1197_v40 }
 0x3ca   :  { %623 = vst [vmem:[#allocation2 + $0x50] sm:$0xff] %v571_v7 }
 0x3cb   :  { %624 = vst.msk [vmem:[#allocation2 + $0x58] sm:$0xff] %vm103_vm0, %v603_v8 }
 0x3cc   :  { %626 = vst [vmem:[#allocation2 + $0x60] sm:$0xff] %v510_v11 }
 0x3cd   :  { %627 = vst [vmem:[#allocation2 + $0x68] sm:$0xff] %v542_v12 }
 0x3cf   :  { %v573_v13 = vpop.f32.mrf.mxu2  ;;  %v605_v14 = vpop.f32.mrf.mxu3 }
 0x3d0   :  { %v574_v15 = vadd.f32 %v573_v13, %v1203_v48  ;;  %v606_v16 = vadd.f32 %v605_v14, %v463_v60  ;;  %v512_v17 = vpop.f32.mrf.mxu0  ;;  %v544_v18 = vpop.f32.mrf.mxu1 }
 0x3d1   :  { %v513_v19 = vadd.f32 %v512_v17, %v1193_v39  ;;  %v545_v20 = vadd.f32 %v544_v18, %v1197_v40 }
 0x3d2   :  { %628 = vst [vmem:[#allocation2 + $0x70] sm:$0xff] %v574_v15 }
 0x3d3   :  { %629 = vst.msk [vmem:[#allocation2 + $0x78] sm:$0xff] %vm103_vm0, %v606_v16 }
 0x3d4   :  { %631 = vst [vmem:[#allocation2 + $0x80] sm:$0xff] %v513_v19 }
 0x3d5   :  { %632 = vst [vmem:[#allocation2 + $0x88] sm:$0xff] %v545_v20 }
 0x3d7   :  { %v576_v21 = vpop.f32.mrf.mxu2  ;;  %v608_v22 = vpop.f32.mrf.mxu3 }
 0x3d8   :  { %v577_v23 = vadd.f32 %v576_v21, %v1203_v48  ;;  %v609_v24 = vadd.f32 %v608_v22, %v463_v60  ;;  %v596_v25 = vpop.f32.mrf.mxu1 }
 0x3d9   :  { %v597_v26 = vadd.f32 %v596_v25, %v463_v60 }
 0x3da   :  { %633 = vst [vmem:[#allocation2 + $0x90] sm:$0xff] %v577_v23 }
 0x3db   :  { %634 = vst.msk [vmem:[#allocation2 + $0x98] sm:$0xff] %vm103_vm0, %v609_v24 }
 0x3dc   :  { %614 = vst.msk [vmem:[#allocation2 + $0x18] sm:$0xff] %vm103_vm0, %v597_v26 }
 0x3dd   :  { %647 = dma.vmem_to_hbm [thread:$0]  %s640_s12, 2560, %s642_s24, [#allocation3], %s728_s25, %s728_s25, %s729_s6  }
 0x3de   :  { %724 = dma.done.wait [#allocation3], 2560  }
 0x3df   :  { %725 = vsyncadd [#allocation3], 4294964736 }
 0x3e0   :  { %652 = vsyncpa [#allocation3], 1 }

</bundles_post_ra>
